<compile_context>
chip_gen: v7x
topology: tpu7x:2x2x1
jax: 0.10.0
libtpu: 0.0.40
codegen_flags: <defaults>
</compile_context>

<pallas_src>
import jax
import jax.numpy as jnp
from jax import lax
from jax.experimental import pallas as pl
from jax.experimental.pallas import tpu as pltpu


# ----------------------------------------------------------------------------
# Fused kernel (one batch element per grid step, NCL layout inside the kernel).
# ----------------------------------------------------------------------------
def fused_decoder_kernel(xs_ref, xb_ref, upw_ref, upb_ref,
                         w1u_ref, w1s_ref, b1_ref, w2_ref, b2_ref, o_ref):
    # xs_ref : (1, Cin, Ls)         x_small tile
    # xb_ref : (1, Cin, Lb)         x_big (skip) tile, Lb = 2*Ls
    # upw_ref: (2, Cout, Cin)       transposed-conv taps (tap, out, in)
    # upb_ref: (Cout, 1)
    # w1u_ref: (Cout, 7*Cout)       conv1 weight, rows acting on the up-conv part
    # w1s_ref: (Cout, 7*Cin)        conv1 weight, rows acting on the skip part
    # b1_ref : (Cout, 1)
    # w2_ref : (Cout, 7*Cout)
    # b2_ref : (Cout, 1)
    # o_ref  : (1, Cout, Lb)
    f32 = jnp.float32
    Ls = xs_ref.shape[2]
    Lb = o_ref.shape[2]

    xs = xs_ref[0].astype(f32)                                   # (Cin, Ls)
    xb = xb_ref[0].astype(f32)                                   # (Cin, Lb)

    # ---- ConvTranspose1d(kernel=2, stride=2) -------------------------------
    # even/odd taps, then interleave along L with 0/1 selection matmuls
    # (keeps the interleave entirely in VMEM; no HBM reshape).
    ye = jnp.dot(upw_ref[0], xs, preferred_element_type=f32)     # (Cout, Ls)
    yo = jnp.dot(upw_ref[1], xs, preferred_element_type=f32)     # (Cout, Ls)
    l_idx = lax.broadcasted_iota(jnp.int32, (Ls, Lb), 0)
    t_idx = lax.broadcasted_iota(jnp.int32, (Ls, Lb), 1)
    even_sel = (t_idx == 2 * l_idx).astype(f32)                  # (Ls, Lb)
    odd_sel = (t_idx == 2 * l_idx + 1).astype(f32)               # (Ls, Lb)
    up = (jnp.dot(ye, even_sel, preferred_element_type=f32)
          + jnp.dot(yo, odd_sel, preferred_element_type=f32)
          + upb_ref[...])                                        # (Cout, Lb)

    # ---- k=7, padding=3 'same' conv as ONE matmul over a shifted-taps slab --
    def conv7(x, w_flat):
        # x: (C, L)   w_flat: (Cout, 7*C) with w_flat[o, k*C + c] = w_torch[o, c, k]
        C, L = x.shape
        zpad = jnp.zeros((C, 3), f32)
        xp = jnp.concatenate([zpad, x, zpad], axis=-1)           # (C, L+6) in VMEM
        taps = jnp.concatenate(
            [xp[:, k:k + L] for k in range(7)], axis=0)          # (7*C, L)
        return jnp.dot(w_flat, taps, preferred_element_type=f32)  # (Cout, L)

    # ---- Conv1d #1 over cat(up, x_big) + ReLU (concat avoided by weight split)
    h = conv7(up, w1u_ref[...]) + conv7(xb, w1s_ref[...]) + b1_ref[...]
    h = jnp.maximum(h, 0.0)                                      # (Cout, Lb)
    # TODO(synk): nn.Dropout implemented as identity (inference/eval semantics).

    # ---- Conv1d #2 + ReLU ----------------------------------------------------
    y = conv7(h, w2_ref[...]) + b2_ref[...]
    y = jnp.maximum(y, 0.0)                                      # (Cout, Lb)

    o_ref[0] = y.astype(o_ref.dtype)


# ----------------------------------------------------------------------------
# Wrapper: PyTorch-layout params in, NCL tensors in/out, one pallas_call.
# ----------------------------------------------------------------------------
def decoder_forward(x_small, x_big, params):
    # x_small: (N, Cin, Ls)  x_big: (N, Cin_big, Lb)   (PyTorch NCL, used natively)
    N, Cin, Ls = x_small.shape
    Nb, Cin_b, Lb = x_big.shape
    assert Nb == N and Lb == 2 * Ls
    Cout = params["up_w"].shape[1]        # torch ConvTranspose1d weight (Cin, Cout, 2)

    # --- torch-layout -> kernel-layout weight prep (tiny, fused by XLA) ------
    up_w = jnp.transpose(params["up_w"], (2, 1, 0))                        # (2, Cout, Cin)
    up_b = params["up_b"].reshape(Cout, 1)
    c1_w = params["c1_w"]                                                  # (Cout, Cout+Cin_b, 7)
    w1u = jnp.transpose(c1_w[:, :Cout, :], (0, 2, 1)).reshape(Cout, 7 * Cout)
    w1s = jnp.transpose(c1_w[:, Cout:, :], (0, 2, 1)).reshape(Cout, 7 * Cin_b)
    b1 = params["c1_b"].reshape(Cout, 1)
    w2 = jnp.transpose(params["c2_w"], (0, 2, 1)).reshape(Cout, 7 * Cout)
    b2 = params["c2_b"].reshape(Cout, 1)

    return pl.pallas_call(
        fused_decoder_kernel,
        out_shape=jax.ShapeDtypeStruct((N, Cout, Lb), x_small.dtype),
        grid=(N,),
        in_specs=[
            pl.BlockSpec((1, Cin, Ls), lambda n: (n, 0, 0)),
            pl.BlockSpec((1, Cin_b, Lb), lambda n: (n, 0, 0)),
            pl.BlockSpec((2, Cout, Cin), lambda n: (0, 0, 0)),
            pl.BlockSpec((Cout, 1), lambda n: (0, 0)),
            pl.BlockSpec((Cout, 7 * Cout), lambda n: (0, 0)),
            pl.BlockSpec((Cout, 7 * Cin_b), lambda n: (0, 0)),
            pl.BlockSpec((Cout, 1), lambda n: (0, 0)),
            pl.BlockSpec((Cout, 7 * Cout), lambda n: (0, 0)),
            pl.BlockSpec((Cout, 1), lambda n: (0, 0)),
        ],
        out_specs=pl.BlockSpec((1, Cout, Lb), lambda n: (n, 0, 0)),
        compiler_params=pltpu.CompilerParams(
            dimension_semantics=("parallel",),
        ),
    )(x_small, x_big, up_w, up_b, w1u, w1s, b1, w2, b2)


# ----------------------------------------------------------------------------
# Pure-JAX reference (same math, no Pallas) for the correctness check.
# ----------------------------------------------------------------------------
def ref_forward(x_small, x_big, p):
    N, Cin, Ls = x_small.shape
    Cout = p["up_w"].shape[1]

    ye = jnp.einsum("ncl,co->nol", x_small, p["up_w"][:, :, 0])
    yo = jnp.einsum("ncl,co->nol", x_small, p["up_w"][:, :, 1])
    up = jnp.stack([ye, yo], axis=-1).reshape(N, Cout, 2 * Ls) + p["up_b"][None, :, None]

    def conv7(x, w, b):
        L = x.shape[2]
        xp = jnp.pad(x, ((0, 0), (0, 0), (3, 3)))
        acc = sum(jnp.einsum("ncl,oc->nol", xp[:, :, k:k + L], w[:, :, k])
                  for k in range(7))
        return acc + b[None, :, None]

    x = jnp.concatenate([up, x_big], axis=1)
    x = jnp.maximum(conv7(x, p["c1_w"], p["c1_b"]), 0.0)
    x = jnp.maximum(conv7(x, p["c2_w"], p["c2_b"]), 0.0)
    return x


def init_params(key, channels_in, channels_out):
    k = jax.random.split(key, 6)
    s = 0.1
    return {
        # PyTorch layouts:
        "up_w": s * jax.random.normal(k[0], (channels_in, channels_out, 2), jnp.float32),
        "up_b": s * jax.random.normal(k[1], (channels_out,), jnp.float32),
        "c1_w": s * jax.random.normal(k[2], (channels_out, channels_in * 2, 7), jnp.float32),
        "c1_b": s * jax.random.normal(k[3], (channels_out,), jnp.float32),
        "c2_w": s * jax.random.normal(k[4], (channels_out, channels_out, 7), jnp.float32),
        "c2_b": s * jax.random.normal(k[5], (channels_out,), jnp.float32),
    }


if __name__ == "__main__":
    channels_in, channels_out = 8, 8
    N, L_small = 2, 8
    L_big = 2 * L_small

    key = jax.random.PRNGKey(0)
    kx, kb, kp = jax.random.split(key, 3)
    # PyTorch-style NCL inputs
    x_small = jax.random.normal(kx, (N, channels_in, L_small), jnp.float32)
    x_big = jax.random.normal(kb, (N, channels_in, L_big), jnp.float32)
    params = init_params(kp, channels_in, channels_out)

    out = jax.block_until_ready(jax.jit(decoder_forward)(x_small, x_big, params))
    ref = jax.block_until_ready(ref_forward(x_small, x_big, params))

    assert out.shape == (N, channels_out, L_big), out.shape
    assert jnp.allclose(out, ref, atol=1e-4, rtol=1e-4), float(jnp.max(jnp.abs(out - ref)))
    print("KERNEL_OK")
</pallas_src>

<mosaic_0001>
module attributes {stable_mosaic.version = 11 : i64} {
  func.func @fused_decoder_kernel(%arg0: i32, %arg1: memref<1x8x8xf32, #tpu.memory_space<vmem>>, %arg2: memref<1x8x16xf32, #tpu.memory_space<vmem>>, %arg3: memref<2x8x8xf32, #tpu.memory_space<vmem>>, %arg4: memref<8x1xf32, #tpu.memory_space<vmem>>, %arg5: memref<8x56xf32, #tpu.memory_space<vmem>>, %arg6: memref<8x56xf32, #tpu.memory_space<vmem>>, %arg7: memref<8x1xf32, #tpu.memory_space<vmem>>, %arg8: memref<8x56xf32, #tpu.memory_space<vmem>>, %arg9: memref<8x1xf32, #tpu.memory_space<vmem>>, %arg10: memref<1x8x16xf32, #tpu.memory_space<vmem>>) attributes {dimension_semantics = [#tpu.dimension_semantics<parallel>], iteration_bounds = array<i64: 2>, scalar_prefetch = 0 : i64, scratch_operands = 0 : i64, tpu.core_type = #tpu.core_type<tc>, window_params = [{transform_indices = @transform_0, window_bounds = array<i64: 1, 8, 8>}, {transform_indices = @transform_1, window_bounds = array<i64: 1, 8, 16>}, {pipeline_mode = #tpu.pipeline_mode<synchronous>, transform_indices = @transform_2, window_bounds = array<i64: 2, 8, 8>}, {pipeline_mode = #tpu.pipeline_mode<synchronous>, transform_indices = @transform_3, window_bounds = array<i64: 8, 1>}, {pipeline_mode = #tpu.pipeline_mode<synchronous>, transform_indices = @transform_4, window_bounds = array<i64: 8, 56>}, {pipeline_mode = #tpu.pipeline_mode<synchronous>, transform_indices = @transform_5, window_bounds = array<i64: 8, 56>}, {pipeline_mode = #tpu.pipeline_mode<synchronous>, transform_indices = @transform_6, window_bounds = array<i64: 8, 1>}, {pipeline_mode = #tpu.pipeline_mode<synchronous>, transform_indices = @transform_7, window_bounds = array<i64: 8, 56>}, {pipeline_mode = #tpu.pipeline_mode<synchronous>, transform_indices = @transform_8, window_bounds = array<i64: 8, 1>}, {transform_indices = @transform_9, window_bounds = array<i64: 1, 8, 16>}]} {
    %c0 = arith.constant 0 : index
    %c0_0 = arith.constant 0 : index
    %c0_1 = arith.constant 0 : index
    %0 = vector.load %arg1[%c0, %c0_0, %c0_1] : memref<1x8x8xf32, #tpu.memory_space<vmem>>, vector<1x8x8xf32>
    %1 = vector.shape_cast %0 : vector<1x8x8xf32> to vector<8x8xf32>
    %c0_2 = arith.constant 0 : index
    %c0_3 = arith.constant 0 : index
    %c0_4 = arith.constant 0 : index
    %2 = vector.load %arg2[%c0_2, %c0_3, %c0_4] : memref<1x8x16xf32, #tpu.memory_space<vmem>>, vector<1x8x16xf32>
    %3 = vector.shape_cast %2 : vector<1x8x16xf32> to vector<8x16xf32>
    %c0_5 = arith.constant 0 : index
    %c0_6 = arith.constant 0 : index
    %c0_7 = arith.constant 0 : index
    %4 = vector.load %arg3[%c0_5, %c0_6, %c0_7] : memref<2x8x8xf32, #tpu.memory_space<vmem>>, vector<1x8x8xf32>
    %5 = vector.shape_cast %4 : vector<1x8x8xf32> to vector<8x8xf32>
    %cst = arith.constant dense<0.000000e+00> : vector<8x8xf32>
    %6 = tpu.matmul %5, %1, %cst {dimension_numbers = #tpu.dot_dimension_numbers<[1], [0], [0], [1], [0, 0, 1, 1], [], []>} : vector<8x8xf32>, vector<8x8xf32>, vector<8x8xf32> -> vector<8x8xf32>
    %c1 = arith.constant 1 : index
    %c0_8 = arith.constant 0 : index
    %c0_9 = arith.constant 0 : index
    %7 = vector.load %arg3[%c1, %c0_8, %c0_9] : memref<2x8x8xf32, #tpu.memory_space<vmem>>, vector<1x8x8xf32>
    %8 = vector.shape_cast %7 : vector<1x8x8xf32> to vector<8x8xf32>
    %cst_10 = arith.constant dense<0.000000e+00> : vector<8x8xf32>
    %9 = tpu.matmul %8, %1, %cst_10 {dimension_numbers = #tpu.dot_dimension_numbers<[1], [0], [0], [1], [0, 0, 1, 1], [], []>} : vector<8x8xf32>, vector<8x8xf32>, vector<8x8xf32> -> vector<8x8xf32>
    %10 = tpu.iota {dimensions = array<i32: 0>} : vector<8x16xi32>
    %11 = tpu.iota {dimensions = array<i32: 1>} : vector<8x16xi32>
    %c2_i32 = arith.constant 2 : i32
    %12 = vector.broadcast %c2_i32 : i32 to vector<8x16xi32>
    %13 = arith.muli %12, %10 : vector<8x16xi32>
    %14 = arith.cmpi eq, %11, %13 : vector<8x16xi32>
    %15 = arith.extui %14 : vector<8x16xi1> to vector<8x16xi32>
    %16 = arith.sitofp %15 : vector<8x16xi32> to vector<8x16xf32>
    %c2_i32_11 = arith.constant 2 : i32
    %17 = vector.broadcast %c2_i32_11 : i32 to vector<8x16xi32>
    %18 = arith.muli %17, %10 : vector<8x16xi32>
    %c1_i32 = arith.constant 1 : i32
    %19 = vector.broadcast %c1_i32 : i32 to vector<8x16xi32>
    %20 = arith.addi %18, %19 : vector<8x16xi32>
    %21 = arith.cmpi eq, %11, %20 : vector<8x16xi32>
    %22 = arith.extui %21 : vector<8x16xi1> to vector<8x16xi32>
    %23 = arith.sitofp %22 : vector<8x16xi32> to vector<8x16xf32>
    %cst_12 = arith.constant dense<0.000000e+00> : vector<8x16xf32>
    %24 = tpu.matmul %6, %16, %cst_12 {dimension_numbers = #tpu.dot_dimension_numbers<[1], [0], [0], [1], [0, 0, 1, 1], [], []>} : vector<8x8xf32>, vector<8x16xf32>, vector<8x16xf32> -> vector<8x16xf32>
    %cst_13 = arith.constant dense<0.000000e+00> : vector<8x16xf32>
    %25 = tpu.matmul %9, %23, %cst_13 {dimension_numbers = #tpu.dot_dimension_numbers<[1], [0], [0], [1], [0, 0, 1, 1], [], []>} : vector<8x8xf32>, vector<8x16xf32>, vector<8x16xf32> -> vector<8x16xf32>
    %26 = arith.addf %24, %25 : vector<8x16xf32>
    %c0_14 = arith.constant 0 : index
    %c0_15 = arith.constant 0 : index
    %27 = vector.load %arg4[%c0_14, %c0_15] : memref<8x1xf32, #tpu.memory_space<vmem>>, vector<8x1xf32>
    %28 = vector.broadcast %27 : vector<8x1xf32> to vector<8x16xf32>
    %29 = arith.addf %26, %28 : vector<8x16xf32>
    %c0_16 = arith.constant 0 : index
    %c0_17 = arith.constant 0 : index
    %30 = vector.load %arg5[%c0_16, %c0_17] : memref<8x56xf32, #tpu.memory_space<vmem>>, vector<8x56xf32>
    %cst_18 = arith.constant 0.000000e+00 : f32
    %31 = vector.broadcast %cst_18 : f32 to vector<8x3xf32>
    %32 = tpu.concatenate %31, %29, %31 in 1 : vector<8x3xf32>, vector<8x16xf32>, vector<8x3xf32> -> vector<8x22xf32>
    %33 = vector.extract_strided_slice %32 {offsets = [0, 0], sizes = [8, 16], strides = [1, 1]} : vector<8x22xf32> to vector<8x16xf32>
    %34 = vector.extract_strided_slice %32 {offsets = [0, 1], sizes = [8, 16], strides = [1, 1]} : vector<8x22xf32> to vector<8x16xf32>
    %35 = vector.extract_strided_slice %32 {offsets = [0, 2], sizes = [8, 16], strides = [1, 1]} : vector<8x22xf32> to vector<8x16xf32>
    %36 = vector.extract_strided_slice %32 {offsets = [0, 3], sizes = [8, 16], strides = [1, 1]} : vector<8x22xf32> to vector<8x16xf32>
    %37 = vector.extract_strided_slice %32 {offsets = [0, 4], sizes = [8, 16], strides = [1, 1]} : vector<8x22xf32> to vector<8x16xf32>
    %38 = vector.extract_strided_slice %32 {offsets = [0, 5], sizes = [8, 16], strides = [1, 1]} : vector<8x22xf32> to vector<8x16xf32>
    %39 = vector.extract_strided_slice %32 {offsets = [0, 6], sizes = [8, 16], strides = [1, 1]} : vector<8x22xf32> to vector<8x16xf32>
    %40 = tpu.concatenate %33, %34, %35, %36, %37, %38, %39 in 0 : vector<8x16xf32>, vector<8x16xf32>, vector<8x16xf32>, vector<8x16xf32>, vector<8x16xf32>, vector<8x16xf32>, vector<8x16xf32> -> vector<56x16xf32>
    %cst_19 = arith.constant dense<0.000000e+00> : vector<8x16xf32>
    %41 = tpu.matmul %30, %40, %cst_19 {dimension_numbers = #tpu.dot_dimension_numbers<[1], [0], [0], [1], [0, 0, 1, 1], [], []>} : vector<8x56xf32>, vector<56x16xf32>, vector<8x16xf32> -> vector<8x16xf32>
    %c0_20 = arith.constant 0 : index
    %c0_21 = arith.constant 0 : index
    %42 = vector.load %arg6[%c0_20, %c0_21] : memref<8x56xf32, #tpu.memory_space<vmem>>, vector<8x56xf32>
    %cst_22 = arith.constant 0.000000e+00 : f32
    %43 = vector.broadcast %cst_22 : f32 to vector<8x3xf32>
    %44 = tpu.concatenate %43, %3, %43 in 1 : vector<8x3xf32>, vector<8x16xf32>, vector<8x3xf32> -> vector<8x22xf32>
    %45 = vector.extract_strided_slice %44 {offsets = [0, 0], sizes = [8, 16], strides = [1, 1]} : vector<8x22xf32> to vector<8x16xf32>
    %46 = vector.extract_strided_slice %44 {offsets = [0, 1], sizes = [8, 16], strides = [1, 1]} : vector<8x22xf32> to vector<8x16xf32>
    %47 = vector.extract_strided_slice %44 {offsets = [0, 2], sizes = [8, 16], strides = [1, 1]} : vector<8x22xf32> to vector<8x16xf32>
    %48 = vector.extract_strided_slice %44 {offsets = [0, 3], sizes = [8, 16], strides = [1, 1]} : vector<8x22xf32> to vector<8x16xf32>
    %49 = vector.extract_strided_slice %44 {offsets = [0, 4], sizes = [8, 16], strides = [1, 1]} : vector<8x22xf32> to vector<8x16xf32>
    %50 = vector.extract_strided_slice %44 {offsets = [0, 5], sizes = [8, 16], strides = [1, 1]} : vector<8x22xf32> to vector<8x16xf32>
    %51 = vector.extract_strided_slice %44 {offsets = [0, 6], sizes = [8, 16], strides = [1, 1]} : vector<8x22xf32> to vector<8x16xf32>
    %52 = tpu.concatenate %45, %46, %47, %48, %49, %50, %51 in 0 : vector<8x16xf32>, vector<8x16xf32>, vector<8x16xf32>, vector<8x16xf32>, vector<8x16xf32>, vector<8x16xf32>, vector<8x16xf32> -> vector<56x16xf32>
    %cst_23 = arith.constant dense<0.000000e+00> : vector<8x16xf32>
    %53 = tpu.matmul %42, %52, %cst_23 {dimension_numbers = #tpu.dot_dimension_numbers<[1], [0], [0], [1], [0, 0, 1, 1], [], []>} : vector<8x56xf32>, vector<56x16xf32>, vector<8x16xf32> -> vector<8x16xf32>
    %54 = arith.addf %41, %53 : vector<8x16xf32>
    %c0_24 = arith.constant 0 : index
    %c0_25 = arith.constant 0 : index
    %55 = vector.load %arg7[%c0_24, %c0_25] : memref<8x1xf32, #tpu.memory_space<vmem>>, vector<8x1xf32>
    %56 = vector.broadcast %55 : vector<8x1xf32> to vector<8x16xf32>
    %57 = arith.addf %54, %56 : vector<8x16xf32>
    %cst_26 = arith.constant 0.000000e+00 : f32
    %58 = vector.broadcast %cst_26 : f32 to vector<8x16xf32>
    %59 = arith.maximumf %57, %58 : vector<8x16xf32>
    %c0_27 = arith.constant 0 : index
    %c0_28 = arith.constant 0 : index
    %60 = vector.load %arg8[%c0_27, %c0_28] : memref<8x56xf32, #tpu.memory_space<vmem>>, vector<8x56xf32>
    %cst_29 = arith.constant 0.000000e+00 : f32
    %61 = vector.broadcast %cst_29 : f32 to vector<8x3xf32>
    %62 = tpu.concatenate %61, %59, %61 in 1 : vector<8x3xf32>, vector<8x16xf32>, vector<8x3xf32> -> vector<8x22xf32>
    %63 = vector.extract_strided_slice %62 {offsets = [0, 0], sizes = [8, 16], strides = [1, 1]} : vector<8x22xf32> to vector<8x16xf32>
    %64 = vector.extract_strided_slice %62 {offsets = [0, 1], sizes = [8, 16], strides = [1, 1]} : vector<8x22xf32> to vector<8x16xf32>
    %65 = vector.extract_strided_slice %62 {offsets = [0, 2], sizes = [8, 16], strides = [1, 1]} : vector<8x22xf32> to vector<8x16xf32>
    %66 = vector.extract_strided_slice %62 {offsets = [0, 3], sizes = [8, 16], strides = [1, 1]} : vector<8x22xf32> to vector<8x16xf32>
    %67 = vector.extract_strided_slice %62 {offsets = [0, 4], sizes = [8, 16], strides = [1, 1]} : vector<8x22xf32> to vector<8x16xf32>
    %68 = vector.extract_strided_slice %62 {offsets = [0, 5], sizes = [8, 16], strides = [1, 1]} : vector<8x22xf32> to vector<8x16xf32>
    %69 = vector.extract_strided_slice %62 {offsets = [0, 6], sizes = [8, 16], strides = [1, 1]} : vector<8x22xf32> to vector<8x16xf32>
    %70 = tpu.concatenate %63, %64, %65, %66, %67, %68, %69 in 0 : vector<8x16xf32>, vector<8x16xf32>, vector<8x16xf32>, vector<8x16xf32>, vector<8x16xf32>, vector<8x16xf32>, vector<8x16xf32> -> vector<56x16xf32>
    %cst_30 = arith.constant dense<0.000000e+00> : vector<8x16xf32>
    %71 = tpu.matmul %60, %70, %cst_30 {dimension_numbers = #tpu.dot_dimension_numbers<[1], [0], [0], [1], [0, 0, 1, 1], [], []>} : vector<8x56xf32>, vector<56x16xf32>, vector<8x16xf32> -> vector<8x16xf32>
    %c0_31 = arith.constant 0 : index
    %c0_32 = arith.constant 0 : index
    %72 = vector.load %arg9[%c0_31, %c0_32] : memref<8x1xf32, #tpu.memory_space<vmem>>, vector<8x1xf32>
    %73 = vector.broadcast %72 : vector<8x1xf32> to vector<8x16xf32>
    %74 = arith.addf %71, %73 : vector<8x16xf32>
    %cst_33 = arith.constant 0.000000e+00 : f32
    %75 = vector.broadcast %cst_33 : f32 to vector<8x16xf32>
    %76 = arith.maximumf %74, %75 : vector<8x16xf32>
    %c0_34 = arith.constant 0 : index
    %c0_35 = arith.constant 0 : index
    %c0_36 = arith.constant 0 : index
    %77 = vector.load %arg10[%c0_34, %c0_35, %c0_36] : memref<1x8x16xf32, #tpu.memory_space<vmem>>, vector<1x8x16xf32>
    %78 = vector.shape_cast %77 : vector<1x8x16xf32> to vector<8x16xf32>
    %79 = vector.shape_cast %76 : vector<8x16xf32> to vector<1x8x16xf32>
    tpu.vector_store %arg10[%c0_34, %c0_35, %c0_36], %79 {strides = array<i32>} : memref<1x8x16xf32, #tpu.memory_space<vmem>>, vector<1x8x16xf32>,
    return
  }
  func.func @transform_0(%arg0: i32) -> (i32, i32, i32) {
    %c0_i32 = arith.constant 0 : i32
    %c0_i32_0 = arith.constant 0 : i32
    %c0_i32_1 = arith.constant 0 : i32
    return %arg0, %c0_i32, %c0_i32_0 : i32, i32, i32
  }
  func.func @transform_1(%arg0: i32) -> (i32, i32, i32) {
    %c0_i32 = arith.constant 0 : i32
    %c0_i32_0 = arith.constant 0 : i32
    %c0_i32_1 = arith.constant 0 : i32
    return %arg0, %c0_i32, %c0_i32_0 : i32, i32, i32
  }
  func.func @transform_2(%arg0: i32) -> (i32, i32, i32) {
    %c0_i32 = arith.constant 0 : i32
    %c0_i32_0 = arith.constant 0 : i32
    %c0_i32_1 = arith.constant 0 : i32
    %c0_i32_2 = arith.constant 0 : i32
    return %c0_i32, %c0_i32_0, %c0_i32_1 : i32, i32, i32
  }
  func.func @transform_3(%arg0: i32) -> (i32, i32) {
    %c0_i32 = arith.constant 0 : i32
    %c0_i32_0 = arith.constant 0 : i32
    %c0_i32_1 = arith.constant 0 : i32
    return %c0_i32, %c0_i32_0 : i32, i32
  }
  func.func @transform_4(%arg0: i32) -> (i32, i32) {
    %c0_i32 = arith.constant 0 : i32
    %c0_i32_0 = arith.constant 0 : i32
    %c0_i32_1 = arith.constant 0 : i32
    return %c0_i32, %c0_i32_0 : i32, i32
  }
  func.func @transform_5(%arg0: i32) -> (i32, i32) {
    %c0_i32 = arith.constant 0 : i32
    %c0_i32_0 = arith.constant 0 : i32
    %c0_i32_1 = arith.constant 0 : i32
    return %c0_i32, %c0_i32_0 : i32, i32
  }
  func.func @transform_6(%arg0: i32) -> (i32, i32) {
    %c0_i32 = arith.constant 0 : i32
    %c0_i32_0 = arith.constant 0 : i32
    %c0_i32_1 = arith.constant 0 : i32
    return %c0_i32, %c0_i32_0 : i32, i32
  }
  func.func @transform_7(%arg0: i32) -> (i32, i32) {
    %c0_i32 = arith.constant 0 : i32
    %c0_i32_0 = arith.constant 0 : i32
    %c0_i32_1 = arith.constant 0 : i32
    return %c0_i32, %c0_i32_0 : i32, i32
  }
  func.func @transform_8(%arg0: i32) -> (i32, i32) {
    %c0_i32 = arith.constant 0 : i32
    %c0_i32_0 = arith.constant 0 : i32
    %c0_i32_1 = arith.constant 0 : i32
    return %c0_i32, %c0_i32_0 : i32, i32
  }
  func.func @transform_9(%arg0: i32) -> (i32, i32, i32) {
    %c0_i32 = arith.constant 0 : i32
    %c0_i32_0 = arith.constant 0 : i32
    %c0_i32_1 = arith.constant 0 : i32
    return %arg0, %c0_i32, %c0_i32_0 : i32, i32, i32
  }
}

</mosaic_0001>

<bundles_post_ra>
// kernel: decoder_forward.1
= control target key start
LH: loop header
LB: loop body
LE: loop exit
PB: predicated region body
PF: predicated region fallthrough
CT: control target
= control target key end

     0   :  { %14 = vsyncpa [#allocation3], 0  ;;  %s1633_s0 = inlined_call_operand.vmem [shape: f32[2,8,8], index: 0, kind: input, shape index: {}]   ;;  %s1634_s1 = inlined_call_operand.vmem [shape: f32[2,8,16], index: 1, kind: input, shape index: {}]   ;;  %s1635_s2 = inlined_call_operand.vmem [shape: f32[2,8,8], index: 2, kind: input, shape index: {}]   ;;  %s1636_s3 = inlined_call_operand.vmem [shape: f32[8,1], index: 3, kind: input, shape index: {}]   ;;  %s1637_s4 = inlined_call_operand.vmem [shape: f32[8,56], index: 4, kind: input, shape index: {}]   ;;  %s1638_s5 = inlined_call_operand.vmem [shape: f32[8,56], index: 5, kind: input, shape index: {}]   ;;  %s1639_s6 = inlined_call_operand.vmem [shape: f32[8,1], index: 6, kind: input, shape index: {}]   ;;  %s1640_s7 = inlined_call_operand.vmem [shape: f32[8,56], index: 7, kind: input, shape index: {}]   ;;  %s1641_s8 = inlined_call_operand.vmem [shape: f32[8,1], index: 8, kind: input, shape index: {}]   ;;  %s1642_s9 = inlined_call_operand.hbm [shape: f32[2,8,16], index: 9, kind: output, shape index: {}]  }
   0x1   :  { %16 = vsyncpa [#allocation3 + $0x1], 0  ;;  %s1429_s30 = smov 0   ;;  %s1431_s10 = smov 0  }
   0x2   :  { %s1433_s11 = smov 0   ;;  %s1435_s12 = smov 0  }
   0x3 LB: > { %s1450_s13 = sadd.s32 4294967295, %s1363_s12   ;;  %s1064_s14 = sadd.s32 4294967294, %s1363_s12   ;;  %s1363_s12 = sphi %s1435_s12, %s1650_s12   ;;  %s1359_s11 = sphi %s1433_s11, %s1649_s11   ;;  %s1355_s10 = sphi %s1431_s10, %s1648_s10   ;;  %s1351_s30 = sphi %s1429_s30, %s1647_s30  }
   0x4   : > { %s1454_s15 = sadd.s32 1, %s1363_s12   ;;  %s228_s16 = sadd.s32 1, %s1359_s11 }
   0x5   : > { %s225_s17 = ssub.s32 %s1363_s12, %s1454_s15  ;;  %p238_p0 = scmp.ne.s32.totalorder %s1359_s11, %s1355_s10 }
   0x6   : > { %p226_p1 = scmp.eq.s32.totalorder %s225_s17, 0  ;;  %p239_p2 = scmp.eq.s32.totalorder %s1450_s13, 1 }
   0x7   : > { %p244_p3 = scmp.ne.s32.totalorder %s1355_s10, %s1351_s30  ;;  %p245_p4 = scmp.eq.s32.totalorder %s1064_s14, 1 }
   0x8   : > { %s1465_s18 = scalar_select %p226_p1, %s1359_s11, %s228_s16  }
   0x9   : > { %p1467_p5 = por %p239_p2, %p238_p0  ;;  %p1471_p6 = por %p245_p4, %p244_p3 }
   0xa   : > { %p1067_p7 = scmp.ge.s32.totalorder %s1363_s12, 1  ;;  %p298_p8 = scmp.lt.s32.totalorder %s1363_s12, 3 }
   0xc   : > { %p299_p9 = pnand %p1067_p7, %p298_p8 }
   0xd   : > { %p337_p10 = scmp.lt.s32.totalorder (!%p299_p9), %s1450_s13, 1  ;;  %v1365_v0 = vmov (!%p299_p9), 0.0   ;;  %vm1366_vm0 = vmmov (!%p299_p9), 0   ;;  %v347_v1 = vld [vmem:[%s1635_s2] sm:$0xff] (!%p299_p9)  ;;  %vm348_vm1 = vcmask (!%p299_p9), 64512   ;;  %v1072_v3 = vld [vmem:[%s1635_s2 + $0x8] sm:$0xff] (!%p299_p9)  ;;  %v497_v4 = vlaneseq (!%p299_p9) }
   0xe   : > { %302 = sbr.rel (%p299_p9) target bundleno = 1409 (0x581), region = 56  ;;  %1122 = vmatprep.subr.mxu1 (!%p299_p9), %v1365_v0  ;;  %1124 = vmatprep.mubr.msk.f32.mxu1 (!%p299_p9), %vm1366_vm0, %v1365_v0  ;;  %v1367_v9 = vmov (!%p299_p9), 1.0   ;;  %v655_v10 = vld [vmem:[%s1636_s3] sm:$0xff] (!%p299_p9)  ;;  %v1368_v11 = vmov (!%p299_p9), 0   ;;  %vm667_vm4 = vcmask (!%p299_p9), 23552   ;;  %v1370_v25 = vmov (!%p299_p9), 0.0|0.0  }
   0xf   : > { %1156 = vmatprep.mubr.msk.f32.mxu0 (!%p299_p9), %vm1366_vm0, %v1365_v0  ;;  %v498_v5 = vshrl.u32 (!%p299_p9), %v497_v4, 7  ;;  %v500_v7 = vand.u32 (!%p299_p9), 127, %v497_v4  ;;  %1275 = vset.pattern.permute.xlu0 (!%p299_p9), %v1368_v11  ;;  %vm669_vm5 = vcmask (!%p299_p9), 154624   ;;  %s1373_s26 = smov (!%p299_p9), 124   ;;  %s1374_s27 = smov (!%p299_p9), 125   ;;  %v863_v32 = vld [vmem:[%s1639_s6] sm:$0xff] (!%p299_p9) }
  0x10   : > { %658 = vperm.xlu0 (!%p299_p9), %1275, %v655_v10   ;;  %1193 = vmatprep.subr.bf16.mxu0 (!%p299_p9), %v1370_v25  ;;  %s1375_s28 = smov (!%p299_p9), 122   ;;  %s1376_s29 = smov (!%p299_p9), 123   ;;  %vm1377_vm6 = vmmov (!%p299_p9), 1   ;;  %v690_v55 = vld [vmem:[%s1638_s5] sm:$0xff] (!%p299_p9)  ;;  %vm716_vm8 = vcmask (!%p299_p9), 457728   ;;  %vm977_vm9 = vcmask (!%p299_p9), 130048  }
  0x11   : > { %v501_v6 = vmul.u32 (!%p299_p9), 2, %v498_v5  ;;  %vm1540_vm7 = vmpackc.low (!%p299_p9), %vm1377_vm6, %vm669_vm5  ;;  %v662_v56 = vld [vmem:[%s1637_s4] sm:$0xff] (!%p299_p9) }
  0x13   : > { %v505_v8 = vadd.s32 (!%p299_p9), 1, %v501_v6  ;;  %vm502_vm3 = vcmp.eq.s32.totalorder (!%p299_p9), %v500_v7, %v501_v6 }
  0x15   : > { %s1482_s21 = scalar_select %p337_p10, %s1450_s13, 1  ;;  %vm506_vm2 = vcmp.eq.s32.totalorder %v500_v7, %v505_v8  ;;  %v897_v7 = vld [vmem:[%s1641_s8] sm:$0xff] }
  0x17   : > { %s1069_s22 = sshll.u32 %s1482_s21, 3  ;;  %s1371_s21 = smov 126  }
  0x18   : > { %s340_s25 = scalar_lea.vmem %s1633_s0, %s1069_s22  ;;  %s344_s24 = scalar_lea.vmem %s1634_s1, %s1069_s22 }
  0x19   : > { %v345_v2 = vld [vmem:[%s340_s25] sm:$0xff]  ;;  %s1369_s25 = smov 3   ;;  %s1372_s22 = smov 127  }
  0x1a   : > { %1123 = vmatpush3.msra.mxu1 %v345_v2  ;;  %v346_v16 = vld [vmem:[%s344_s24] sm:$0xff] }
  0x1b   : > { %1125 = vmatmul.mubr.msk.f32.vlgmr.msra.gmra.mrb[0].mxu1 %vm348_vm1, %v347_v1  ;;  %1127 = vmatprep.subr.mxu1 %v1365_v0 }
  0x1c   : > { %1128 = vmatpush3.msra.mxu1 %v345_v2  ;;  %1129 = vmatprep.mubr.msk.f32.mxu1 %vm1366_vm0, %v1365_v0 }
  0x1d   : > { %1132 = vmatprep.subr.mxu1 %v1365_v0  ;;  %692 = vrot.lane.b32.xlu1 %v346_v16, %s1369_s25  ;;  %v871_v16 = vld [vmem:[%s1640_s7] sm:$0xff] }
  0x1f   : > { %1130 = vmatmul.mubr.msk.f32.vlgmr.msra.gmra.mrb[2].mxu1 %vm348_vm1, %v1072_v3 }
  0x20   : > { %1134 = vmatprep.mubr.msk.f32.mxu1 %vm1366_vm0, %v1365_v0  ;;  %1133 = vmatpush3.msk.msra.mxu1 %vm506_vm2, %v1367_v9 }
  0x21   : > { %1137 = vmatprep.subr.mxu1 %v1365_v0 }
  0x8f   : > { %v659_v20 = vpop.permute.xlu0 %658  ;;  %v693_v24 = vpop.permute.xlu1 %692 }
  0x90   : > { %v695_v26 = vsel %vm667_vm4, 0.0, %v693_v24 }
  0x91   : > { %v696_v27 = vsel %vm669_vm5, %v695_v26, 0.0 }
  0xee   : > { %v418_v12 = vpop.f32.mrb[0].mxu1 }
  0xef   : > { %v1126_v13 = vpop.f32.mrb[1].mxu1 }
  0xf2   : > { %v493_v14 = vpop.f32.mrb[2].mxu1 }
  0xf3   : > { %v1131_v15 = vpop.f32.mrb[3].mxu1  ;;  %1135 = vmatmul.mubr.msk.f32.vlgmr.msra.gmra.mrb[4].mxu1 %vm348_vm1, %v493_v14 }
  0xf4   : > { %1138 = vmatpush3.msk.msra.mxu1 %vm502_vm3, %v1367_v9  ;;  %1139 = vmatprep.mubr.msk.f32.mxu1 %vm1366_vm0, %v1365_v0 }
  0xf5   : > { %1203 = vmatprep.subr.bf16.mxu1 %v1370_v25 }
  0xf7   : > { %1140 = vmatmul.mubr.msk.f32.vlgmr.msra.gmra.mrb[6].mxu1 %vm348_vm1, %v418_v12 }
  0xf8   : > { %1173 = vmatprep.mubr.msk.f32.mxu1 %vm1366_vm0, %v1365_v0 }
 0x1c6   : > { %v578_v17 = vpop.f32.mrb[4].mxu1 }
 0x1c7   : > { %v1136_v18 = vpop.f32.mrb[5].mxu1 }
 0x1ca   : > { %v651_v19 = vpop.f32.mrb[6].mxu1 }
 0x1cb   : > { %v652_v21 = vadd.f32 %v651_v19, %v578_v17  ;;  %v1141_v22 = vpop.f32.mrb[7].mxu1 }
 0x1cd   : > { %v661_v23 = vadd.f32 %v659_v20, %v652_v21 }
 0x1cf   : > { %664 = vrot.lane.b32.xlu0 %v661_v23, %s1369_s25 }
 0x241   : > { %v665_v28 = vpop.permute.xlu0 %664 }
 0x242   : > { %v668_v29 = vsel %vm667_vm4, 0.0, %v665_v28 }
 0x243   : > { %v670_v30 = vsel %vm669_vm5, %v668_v29, 0.0 }
 0x244   : > { %v1281_v31 = vpack.i.bf16 %v696_v27, %v670_v30 }
 0x246   : > { %1282 = vrot.lane.b32.xlu0 %v1281_v31, %s1371_s21  ;;  %1277 = vrot.lane.b32.xlu1 %v1281_v31, %s1372_s22 }
 0x24a   : > { %1292 = vrot.lane.b32.xlu0 %v1281_v31, %s1373_s26  ;;  %1287 = vrot.lane.b32.xlu1 %v1281_v31, %s1374_s27 }
 0x24e   : > { %687 = vrot.lane.b32.xlu0 %v670_v30, %s1375_s28  ;;  %1297 = vrot.lane.b32.xlu1 %v1281_v31, %s1376_s29 }
 0x252   : > { %866 = vperm.xlu0 %1275, %v863_v32   ;;  %713 = vrot.lane.b32.xlu1 %v696_v27, %s1375_s28 }
 0x2b8   : > { %v1283_v33 = vpop.permute.xlu0 %1282  ;;  %v1278_v34 = vpop.permute.xlu1 %1277 }
 0x2b9   : > { %v1280_v35 = vunpack.i.h.bf16 %v1278_v34  ;;  %v1279_v36 = vunpack.i.l.bf16 %v1278_v34  ;;  %v1285_v41 = vunpack.i.h.bf16 %v1283_v33  ;;  %v1284_v42 = vunpack.i.l.bf16 %v1283_v33 }
 0x2bb   : > { %v1194_v38 = vpack.c.bf16 %v1280_v35, %v695_v26  ;;  %v1204_v39 = vpack.c.bf16 %v1279_v36, %v668_v29 }
 0x2bc   : > { %v1288_v40 = vpop.permute.xlu1 %1287  ;;  %v1293_v45 = vpop.permute.xlu0 %1292 }
 0x2bd   : > { %v1290_v43 = vunpack.i.h.bf16 %v1288_v40  ;;  %v1289_v44 = vunpack.i.l.bf16 %v1288_v40  ;;  %1196 = vmatpush3.bf16.msk.msra.mxu0 %vm1540_vm7, %v1194_v38  ;;  %1206 = vmatpush3.bf16.msk.msra.mxu1 %vm1540_vm7, %v1204_v39  ;;  %v1295_v49 = vunpack.i.h.bf16 %v1293_v45  ;;  %v1294_v50 = vunpack.i.l.bf16 %v1293_v45 }
 0x2be   : > { %1197 = vmatprep.subr.bf16.mxu0 %v1370_v25  ;;  %1207 = vmatprep.subr.bf16.mxu1 %v1370_v25 }
 0x2bf   : > { %v1198_v46 = vpack.c.bf16 %v1290_v43, %v1285_v41  ;;  %v1208_v47 = vpack.c.bf16 %v1289_v44, %v1284_v42 }
 0x2c0   : > { %v1298_v48 = vpop.permute.xlu1 %1297  ;;  %v688_v57 = vpop.permute.xlu0 %687 }
 0x2c1   : > { %v1300_v51 = vunpack.i.h.bf16 %v1298_v48  ;;  %v1299_v52 = vunpack.i.l.bf16 %v1298_v48  ;;  %1199 = vmatpush3.bf16.msra.mxu0 %v1198_v46  ;;  %1209 = vmatpush3.bf16.msra.mxu1 %v1208_v47 }
 0x2c2   : > { %1200 = vmatprep.subr.bf16.mxu0 %v1370_v25  ;;  %1210 = vmatprep.subr.bf16.mxu1 %v1370_v25 }
 0x2c3   : > { %v1201_v53 = vpack.c.bf16 %v1300_v51, %v1295_v49  ;;  %v1211_v54 = vpack.c.bf16 %v1299_v52, %v1294_v50 }
 0x2c4   : > { %v714_v58 = vpop.permute.xlu1 %713 }
 0x2c5   : > { %1202 = vmatpush3.bf16.msra.mxu0 %v1201_v53  ;;  %1212 = vmatpush3.bf16.msra.mxu1 %v1211_v54 }
 0x2c6   : > { %1154 = vmatprep.subr.mxu0 %v1365_v0  ;;  %1171 = vmatprep.subr.mxu1 %v1365_v0 }
 0x2c9   : > { %1155 = vmatpush3.msra.mxu0 %v714_v58  ;;  %1172 = vmatpush3.msra.mxu1 %v688_v57 }
 0x2ca   : > { %1157 = vmatmul.mubr.msk.f32.vlgmr.msra.gmra.mrb[0].mxu0 %vm716_vm8, %v690_v55  ;;  %1174 = vmatmul.mubr.msk.f32.vlgmr.msra.gmra.mrb[8].mxu1 %vm716_vm8, %v662_v56 }
 0x2cb   : > { %1213 = vmatprep.subr.bf16.mxu0 %v1370_v25  ;;  %1190 = vmatprep.mubr.msk.f32.mxu0 %vm1366_vm0, %v1365_v0 }
 0x2d1   : > { %v867_v1 = vpop.permute.xlu0 %866 }
 0x39d   : > { %v786_v59 = vpop.f32.mrb[0].mxu0  ;;  %v859_v60 = vpop.f32.mrb[8].mxu1 }
 0x39e   : > { %v860_v61 = vadd.f32 %v859_v60, %v786_v59  ;;  %v1158_v62 = vpop.f32.mrb[1].mxu0  ;;  %v1175_v63 = vpop.f32.mrb[9].mxu1 }
 0x3a0   : > { %v869_v2 = vadd.f32 %v867_v1, %v860_v61 }
 0x3a2   : > { %v870_v3 = vmax.f32 %v869_v2, 0.0 }
 0x3a4   : > { %873 = vrot.lane.b32.xlu1 %v870_v3, %s1369_s25 }
 0x416   : > { %v874_v4 = vpop.permute.xlu1 %873 }
 0x417   : > { %v876_v5 = vsel %vm667_vm4, 0.0, %v874_v4 }
 0x418   : > { %v877_v6 = vsel %vm669_vm5, %v876_v5, 0.0 }
 0x419   : > { %882 = vrot.lane.b32.xlu1 %v877_v6, %s1371_s21  ;;  %879 = vrot.lane.b32.xlu0 %v877_v6, %s1372_s22  ;;  %s334_s22 = sand.u32 1, %s1355_s10  }
 0x41a   : > { %s980_s16 = scalar_lea.sflag [#allocation3], %s334_s22 }
 0x41d   : > { %888 = vrot.lane.b32.xlu1 %v877_v6, %s1373_s26  ;;  %885 = vrot.lane.b32.xlu0 %v877_v6, %s1374_s27  ;;  %s1068_s26 = sshll.u32 %s334_s22, 3  ;;  %s1087_s27 = sshll.u32 %s1450_s13, 7 }
 0x41e   : > { %s1591_s14 = scalar_lea.hbm %s1642_s9, %s1087_s27  ;;  %s1378_s13 = smov [#allocation2]  }
 0x41f   : > { %s1305_s25 = sshll.u32 %s1378_s13, 4  ;;  %s1306_s25 = int_to_ptr.vmem [resolvable:$false] %s1305_s25 }
 0x420   : > { %s1307_s21 = scalar_lea.vmem %s1306_s25, 256 }
 0x421   : > { %894 = vrot.lane.b32.xlu1 %v877_v6, %s1375_s28  ;;  %891 = vrot.lane.b32.xlu0 %v877_v6, %s1376_s29  ;;  %s336_s28 = scalar_lea.vmem [#allocation2], %s1068_s26 }
 0x422   : > { %s993_s29 = sshll.u32 %s336_s28, 4  ;;  %s1593_s29 = int_to_ptr.vmem [resolvable:$true] %s993_s29 }
 0x423   : > { %s1301_s17 = scalar_lea.vmem %s1593_s29, 128  ;;  %p1308_p0 = scmp.lt.s32.totalorder %s1593_s29, %s1306_s25 }
 0x424   : > { %p1302_p11 = scmp.ne.s32.totalorder %s1593_s29, %s1301_s17  ;;  %p1309_p1 = scmp.lt.s32.totalorder %s1307_s21, %s1301_s17 }
 0x425   : > { %900 = vperm.xlu0 %1275, %v897_v7  }
 0x426   : > { %p1303_p12 = pnand %p1302_p11, %p1467_p5  ;;  %p1310_p2 = por %p1309_p1, %p1308_p0 }
 0x428   : > { %p1304_p13 = pneg %p1303_p12 }
 0x42a   : > { %p1311_p3 = pnand %p1310_p2, %p1304_p13 }
 0x48b   : > { %v880_v8 = vpop.permute.xlu0 %879  ;;  %v883_v10 = vpop.permute.xlu1 %882 }
 0x48c   : > { %v1214_v9 = vpack.c.bf16 %v880_v8, %v876_v5 }
 0x48e   : > { %1216 = vmatpush3.bf16.msk.msra.mxu0 %vm1540_vm7, %v1214_v9 }
 0x48f   : > { %v886_v11 = vpop.permute.xlu0 %885  ;;  %1217 = vmatprep.subr.bf16.mxu0 %v1370_v25  ;;  %v889_v13 = vpop.permute.xlu1 %888 }
 0x490   : > { %v1218_v12 = vpack.c.bf16 %v886_v11, %v883_v10 }
 0x492   : > { %1219 = vmatpush3.bf16.msra.mxu0 %v1218_v12 }
 0x493   : > { %v892_v14 = vpop.permute.xlu0 %891  ;;  %1220 = vmatprep.subr.bf16.mxu0 %v1370_v25  ;;  %v895_v17 = vpop.permute.xlu1 %894 }
 0x494   : > { %v1221_v15 = vpack.c.bf16 %v892_v14, %v889_v13 }
 0x496   : > { %1222 = vmatpush3.bf16.msra.mxu0 %v1221_v15 }
 0x497   : > { %1188 = vmatprep.subr.mxu0 %v1365_v0 }
 0x49a   : > { %1189 = vmatpush3.msra.mxu0 %v895_v17 }
 0x49b   : > { %1191 = vmatmul.mubr.msk.f32.vlgmr.msra.gmra.mrb[2].mxu0 %vm716_vm8, %v871_v16 }
 0x4a4   : > { %v901_v18 = vpop.permute.xlu0 %900 }
 0x56e   : > { %v972_v19 = vpop.f32.mrb[2].mxu0 }
 0x56f   : > { %v973_v20 = vadd.f32 %v972_v19, %v901_v18  ;;  %v1192_v21 = vpop.f32.mrb[3].mxu0 }
 0x571   : > { %v976_v0 = vmax.f32 %v973_v20, 0.0 }
 0x573   : > { %978 = vst.msk [vmem:[%s336_s28] sm:$0xff] %vm977_vm9, %v976_v0 }
 0x574   : > { %1314 = shalt.err (!%p1311_p3)
}
 0x575   : > { %s1315_s22 = scalar_lea.hbm %s1591_s14, 128  ;;  %s1319_s28 = scalar_lea.hbm %s1642_s9, 256 }
 0x576   : > { %p1316_p4 = scmp.ne.s32.totalorder %s1591_s14, %s1315_s22  ;;  %p1320_p9 = scmp.lt.u32.totalorder %s1591_s14, %s1642_s9 }
 0x577   : > { %p1321_p10 = scmp.lt.u32.totalorder %s1319_s28, %s1315_s22  ;;  %p1323_p12 = scmp.lt.u32.totalorder %s1315_s22, %s1591_s14 }
 0x578   : > { %p1317_p7 = pnand %p1316_p4, %p1467_p5 }
 0x579   : > { %p1322_p11 = por %p1321_p10, %p1320_p9 }
 0x57a   : > { %p1318_p8 = pneg %p1317_p7 }
 0x57b   : > { %p1324_p13 = por %p1323_p12, %p1322_p11 }
 0x57d   : > { %p1325_p0 = pnand %p1324_p13, %p1318_p8 }
 0x57f   : > { %1328 = shalt.err (!%p1325_p0)
}
 0x580   : > { %1223 = dma.vmem_to_hbm [thread:$0]  (%p1467_p5), %s1593_s29, 128, %s1591_s14, %s980_s16  }
 0x581 PF: > { %p1229_p1 = scmp.ge.s32.totalorder %s1363_s12, 2  ;;  %s1005_s17 = sand.u32 1, %s1351_s30  }
 0x582   : > { %s1006_s13 = scalar_lea.sflag [#allocation3], %s1005_s17 }
 0x583   : > { %p1226_p2 = pnand %p1229_p1, %p1471_p6 }
 0x585   : > { %1346 = dma.done.wait (!%p1226_p2), %s1006_s13, 128  }
 0x586   : > { %1348 = vsyncadd (!%p1226_p2), %s1006_s13, 4294967168  ;;  %p19_p3 = scmp.ge.s32.totalorder %s1454_s15, 4   ;;  %s1647_s30 = smov %s1355_s10 }
 0x587   : > { %s1648_s10 = smov %s1359_s11  ;;  %s1649_s11 = smov %s1465_s18 }
 0x588   : > { %s1650_s12 = smov %s1454_s15  ;;  %21 = sbr.rel (!%p19_p3) target bundleno = 3 (0x3), region = 95 }
 0x58f   :  { %1011 = vsyncpa [#allocation3], 1 }
 0x590   :  { %1013 = vsyncpa [#allocation3 + $0x1], 1 }

</bundles_post_ra>
